<compile_context>
chip_gen: v5e
topology: v5e:2x2
jax: 0.10.0
libtpu: 0.0.40
codegen_flags: <defaults>
</compile_context>

<pallas_src>
import functools
import math

import jax
import jax.numpy as jnp
from jax.experimental import pallas as pl
from jax.experimental.pallas import tpu as pltpu


def _cdiv(a, b):
    return (a + b - 1) // b


def _round_up(x, m):
    return ((x + m - 1) // m) * m


def _fc_kernel(x_ref, w1_ref, b1_ref, w2_ref, b2_ref, o_ref):
    # Hidden layer: (TB, K) @ (K, Hp) + (1, Hp), ReLU.  f32 accumulation.
    h = jnp.dot(x_ref[...], w1_ref[...], preferred_element_type=jnp.float32)
    h = jnp.maximum(h + b1_ref[...], 0.0)
    # Classifier: (TB, Hp) @ (Hp, Np) + (1, Np).
    out = jnp.dot(h.astype(w2_ref.dtype), w2_ref[...],
                  preferred_element_type=jnp.float32)
    o_ref[...] = (out + b2_ref[...]).astype(o_ref.dtype)


@functools.partial(jax.jit, static_argnames=("compute_dtype",))
def simple_fc_forward(x, w1, b1, w2, b2, compute_dtype=jnp.bfloat16):
    """x: (B, 1, 28, 28) float32. w1: (784, H), b1: (1, H), w2: (H, 10),
    b2: (1, 10). Returns logits (B, 10) float32 (path='all' semantics)."""
    B = x.shape[0]
    K = 28 * 28
    H = w1.shape[1]
    N = w2.shape[1]

    # Lane-padded feature dims (hidden / logits) -> full MXU tiles, unmasked
    # stores.  K stays at 784 (no extra HBM pass over x).
    Hp = _round_up(max(H, 1), 128)   # e.g. 32  -> 128
    Np = _round_up(N, 128)           # 10 -> 128

    # Batch tiling: multiple of 8 sublanes, cap 1024 rows, and an even number
    # of grid steps (>= 2) so both v7x TensorCores always get work.
    B8 = _round_up(max(B, 1), 8)
    TB_CAP = 1024
    n_steps = max(2, 2 * _cdiv(B8, 2 * TB_CAP))
    TB = _round_up(_cdiv(B8, n_steps), 8)
    Bp = TB * n_steps

    # nn.Flatten on NCHW, cast BEFORE any padding so the only extra HBM pass
    # (small batch-rounding pad, if any) is written in the narrow dtype.
    x_flat = x.reshape(B, K).astype(compute_dtype)
    if Bp != B:
        x_in = jnp.zeros((Bp, K), compute_dtype).at[:B, :].set(x_flat)
    else:
        x_in = x_flat

    # Weight padding is tiny (feature dims only); zero rows/cols are exact
    # (relu(0 + 0) = 0, zero W2 rows contribute nothing).
    w1_p = jnp.zeros((K, Hp), compute_dtype).at[:, :H].set(
        w1.astype(compute_dtype))
    w2_p = jnp.zeros((Hp, Np), compute_dtype).at[:H, :N].set(
        w2.astype(compute_dtype))
    b1_p = jnp.zeros((1, Hp), jnp.float32).at[:, :H].set(
        b1.astype(jnp.float32))
    b2_p = jnp.zeros((1, Np), jnp.float32).at[:, :N].set(
        b2.astype(jnp.float32))

    itemsize = jnp.dtype(compute_dtype).itemsize
    vmem_bytes = (
        2 * TB * K * itemsize        # x tile, double-buffered
        + 2 * K * Hp * itemsize      # W1 (resident + spare buffer)
        + 2 * Hp * Np * itemsize     # W2
        + 2 * (Hp + Np) * 4          # biases
        + 2 * TB * Np * 4            # out tile, double-buffered
        + TB * Hp * 4                # hidden activation working set
    )
    # v7x has only 64 MiB VMEM per TensorCore -> cap scoped request at 48 MiB.
    vmem_limit = int(min(max(2 * vmem_bytes, 16 << 20), 48 << 20))

    cost = pl.CostEstimate(
        flops=2 * Bp * (K * Hp + Hp * Np),
        transcendentals=0,
        bytes_accessed=(x_in.size * itemsize
                        + w1_p.size * itemsize
                        + w2_p.size * itemsize
                        + (Hp + Np) * 4
                        + Bp * Np * 4),
    )

    out_pad = pl.pallas_call(
        _fc_kernel,
        out_shape=jax.ShapeDtypeStruct((Bp, Np), jnp.float32),
        grid_spec=pltpu.PrefetchScalarGridSpec(
            num_scalar_prefetch=0,
            grid=(Bp // TB,),
            in_specs=[
                # x: streamed batch tiles; last block dim == full array dim
                # (784), so no K padding needed (lane tail masked by Mosaic).
                pl.BlockSpec((TB, K), lambda i: (i, 0)),
                pl.BlockSpec((K, Hp), lambda i: (0, 0)),    # W1: resident
                pl.BlockSpec((1, Hp), lambda i: (0, 0)),    # b1: resident
                pl.BlockSpec((Hp, Np), lambda i: (0, 0)),   # W2: resident
                pl.BlockSpec((1, Np), lambda i: (0, 0)),    # b2: resident
            ],
            out_specs=pl.BlockSpec((TB, Np), lambda i: (i, 0)),
        ),
        compiler_params=pltpu.CompilerParams(
            dimension_semantics=("parallel",),   # megacore batch split on v7x
            vmem_limit_bytes=vmem_limit,
        ),
        cost_estimate=cost,
    )(x_in, w1_p, b1_p, w2_p, b2_p)

    return out_pad[:B, :N].astype(jnp.float32)


def init_params(n_hidden_units, key):
    """Deterministic init mirroring Simple_FC.__init__ (weights, transposed to
    (in, out)) + PyTorch default Linear bias init U(-1/sqrt(fan_in), ...)."""
    k_w1, k_b1, k_w2, k_b2 = jax.random.split(key, 4)
    in1, out1 = 784, n_hidden_units
    in2, out2 = n_hidden_units, 10

    if n_hidden_units == 1:
        # xavier_uniform_, gain=1.0: U(-a, a), a = sqrt(6 / (fan_in + fan_out))
        a1 = math.sqrt(6.0 / (in1 + out1))
        a2 = math.sqrt(6.0 / (in2 + out2))
        w1 = jax.random.uniform(k_w1, (in1, out1), jnp.float32, -a1, a1)
        w2 = jax.random.uniform(k_w2, (in2, out2), jnp.float32, -a2, a2)
    else:
        # normal_(mean=0.0, std=0.1)
        w1 = 0.1 * jax.random.normal(k_w1, (in1, out1), jnp.float32)
        w2 = 0.1 * jax.random.normal(k_w2, (in2, out2), jnp.float32)

    bb1 = 1.0 / math.sqrt(in1)
    bb2 = 1.0 / math.sqrt(in2)
    b1 = jax.random.uniform(k_b1, (1, out1), jnp.float32, -bb1, bb1)
    b2 = jax.random.uniform(k_b2, (1, out2), jnp.float32, -bb2, bb2)
    return w1, b1, w2, b2


if __name__ == "__main__":
    key = jax.random.PRNGKey(0)
    k_params, k_x = jax.random.split(key)

    n_hidden_units = 32
    batch = 8

    w1, b1, w2, b2 = init_params(n_hidden_units, k_params)
    x = jax.random.normal(k_x, (batch, 1, 28, 28), jnp.float32)

    ref = jnp.maximum(x.reshape(batch, -1) @ w1 + b1, 0.0) @ w2 + b2

    # Default path: bf16 activations/weights, f32 accumulation.
    out = simple_fc_forward(x, w1, b1, w2, b2)
    out = jax.block_until_ready(out)
    assert out.shape == (batch, 10)
    assert jnp.allclose(out, ref, atol=2.5e-1, rtol=5e-2), (
        float(jnp.max(jnp.abs(out - ref))))

    # f32 compute path (near-exact vs. reference).
    out_f32 = simple_fc_forward(x, w1, b1, w2, b2, compute_dtype=jnp.float32)
    out_f32 = jax.block_until_ready(out_f32)
    assert out_f32.shape == (batch, 10)
    assert jnp.allclose(out_f32, ref, atol=1e-3, rtol=1e-4), (
        float(jnp.max(jnp.abs(out_f32 - ref))))

    print("KERNEL_OK")
</pallas_src>

<mosaic_0001>
module attributes {stable_mosaic.version = 11 : i64} {
  func.func @_fc_kernel(%arg0: i32, %arg1: memref<8x784xbf16, #tpu.memory_space<vmem>>, %arg2: memref<784x128xbf16, #tpu.memory_space<vmem>>, %arg3: memref<1x128xf32, #tpu.memory_space<vmem>>, %arg4: memref<128x128xbf16, #tpu.memory_space<vmem>>, %arg5: memref<1x128xf32, #tpu.memory_space<vmem>>, %arg6: memref<8x128xf32, #tpu.memory_space<vmem>>) attributes {dimension_semantics = [#tpu.dimension_semantics<parallel>], iteration_bounds = array<i64: 2>, scalar_prefetch = 0 : i64, scratch_operands = 0 : i64, tpu.core_type = #tpu.core_type<tc>, window_params = [{transform_indices = @transform_0, window_bounds = array<i64: 8, 784>}, {pipeline_mode = #tpu.pipeline_mode<synchronous>, transform_indices = @transform_1, window_bounds = array<i64: 784, 128>}, {pipeline_mode = #tpu.pipeline_mode<synchronous>, transform_indices = @transform_2, window_bounds = array<i64: 1, 128>}, {pipeline_mode = #tpu.pipeline_mode<synchronous>, transform_indices = @transform_3, window_bounds = array<i64: 128, 128>}, {pipeline_mode = #tpu.pipeline_mode<synchronous>, transform_indices = @transform_4, window_bounds = array<i64: 1, 128>}, {transform_indices = @transform_5, window_bounds = array<i64: 8, 128>}]} {
    %c0 = arith.constant 0 : index
    %c0_0 = arith.constant 0 : index
    %0 = vector.load %arg1[%c0, %c0_0] : memref<8x784xbf16, #tpu.memory_space<vmem>>, vector<8x784xbf16>
    %c0_1 = arith.constant 0 : index
    %c0_2 = arith.constant 0 : index
    %1 = vector.load %arg2[%c0_1, %c0_2] : memref<784x128xbf16, #tpu.memory_space<vmem>>, vector<784x128xbf16>
    %cst = arith.constant dense<0.000000e+00> : vector<8x128xf32>
    %2 = tpu.matmul %0, %1, %cst {dimension_numbers = #tpu.dot_dimension_numbers<[1], [0], [0], [1], [0, 0, 1, 1], [], []>} : vector<8x784xbf16>, vector<784x128xbf16>, vector<8x128xf32> -> vector<8x128xf32>
    %c0_3 = arith.constant 0 : index
    %c0_4 = arith.constant 0 : index
    %3 = vector.load %arg3[%c0_3, %c0_4] : memref<1x128xf32, #tpu.memory_space<vmem>>, vector<1x128xf32>
    %4 = vector.broadcast %3 : vector<1x128xf32> to vector<8x128xf32>
    %5 = arith.addf %2, %4 : vector<8x128xf32>
    %cst_5 = arith.constant 0.000000e+00 : f32
    %6 = vector.broadcast %cst_5 : f32 to vector<8x128xf32>
    %7 = arith.maximumf %5, %6 : vector<8x128xf32>
    %8 = arith.truncf %7 : vector<8x128xf32> to vector<8x128xbf16>
    %c0_6 = arith.constant 0 : index
    %c0_7 = arith.constant 0 : index
    %9 = vector.load %arg4[%c0_6, %c0_7] : memref<128x128xbf16, #tpu.memory_space<vmem>>, vector<128x128xbf16>
    %cst_8 = arith.constant dense<0.000000e+00> : vector<8x128xf32>
    %10 = tpu.matmul %8, %9, %cst_8 {dimension_numbers = #tpu.dot_dimension_numbers<[1], [0], [0], [1], [0, 0, 1, 1], [], []>} : vector<8x128xbf16>, vector<128x128xbf16>, vector<8x128xf32> -> vector<8x128xf32>
    %c0_9 = arith.constant 0 : index
    %c0_10 = arith.constant 0 : index
    %11 = vector.load %arg5[%c0_9, %c0_10] : memref<1x128xf32, #tpu.memory_space<vmem>>, vector<1x128xf32>
    %12 = vector.broadcast %11 : vector<1x128xf32> to vector<8x128xf32>
    %13 = arith.addf %10, %12 : vector<8x128xf32>
    %c0_11 = arith.constant 0 : index
    %c0_12 = arith.constant 0 : index
    %14 = vector.load %arg6[%c0_11, %c0_12] : memref<8x128xf32, #tpu.memory_space<vmem>>, vector<8x128xf32>
    tpu.vector_store %arg6[%c0_11, %c0_12], %13 {strides = array<i32>} : memref<8x128xf32, #tpu.memory_space<vmem>>, vector<8x128xf32>,
    return
  }
  func.func @transform_0(%arg0: i32) -> (i32, i32) {
    %c0_i32 = arith.constant 0 : i32
    %c0_i32_0 = arith.constant 0 : i32
    return %arg0, %c0_i32 : i32, i32
  }
  func.func @transform_1(%arg0: i32) -> (i32, i32) {
    %c0_i32 = arith.constant 0 : i32
    %c0_i32_0 = arith.constant 0 : i32
    %c0_i32_1 = arith.constant 0 : i32
    return %c0_i32, %c0_i32_0 : i32, i32
  }
  func.func @transform_2(%arg0: i32) -> (i32, i32) {
    %c0_i32 = arith.constant 0 : i32
    %c0_i32_0 = arith.constant 0 : i32
    %c0_i32_1 = arith.constant 0 : i32
    return %c0_i32, %c0_i32_0 : i32, i32
  }
  func.func @transform_3(%arg0: i32) -> (i32, i32) {
    %c0_i32 = arith.constant 0 : i32
    %c0_i32_0 = arith.constant 0 : i32
    %c0_i32_1 = arith.constant 0 : i32
    return %c0_i32, %c0_i32_0 : i32, i32
  }
  func.func @transform_4(%arg0: i32) -> (i32, i32) {
    %c0_i32 = arith.constant 0 : i32
    %c0_i32_0 = arith.constant 0 : i32
    %c0_i32_1 = arith.constant 0 : i32
    return %c0_i32, %c0_i32_0 : i32, i32
  }
  func.func @transform_5(%arg0: i32) -> (i32, i32) {
    %c0_i32 = arith.constant 0 : i32
    %c0_i32_0 = arith.constant 0 : i32
    return %arg0, %c0_i32 : i32, i32
  }
}

</mosaic_0001>

<bundles_post_ra>
// kernel: simple_fc_forward.1
= control target key start
LH: loop header
LB: loop body
LE: loop exit
PB: predicated region body
PF: predicated region fallthrough
CT: control target
= control target key end

     0   :  { %s1224_s18 = smov 0   ;;  %s1432_s0 = inlined_call_operand.vmem [shape: bf16[16,784], index: 0, kind: input, shape index: {}]   ;;  %s1433_s1 = inlined_call_operand.vmem [shape: bf16[784,128], index: 1, kind: input, shape index: {}]   ;;  %s1434_s2 = inlined_call_operand.vmem [shape: f32[1,128], index: 2, kind: input, shape index: {}]   ;;  %s1435_s3 = inlined_call_operand.vmem [shape: bf16[128,128], index: 3, kind: input, shape index: {}]   ;;  %s1436_s4 = inlined_call_operand.vmem [shape: f32[1,128], index: 4, kind: input, shape index: {}]   ;;  %s1437_s5 = inlined_call_operand.vmem [shape: f32[16,128], index: 5, kind: output, shape index: {}]  }
   0x1 LB: > { %s880_s19 = sadd.s32 4294967295, %s1192_s18   ;;  %p884_p0 = scmp.ge.s32.totalorder %s1192_s18, 1  ;;  %s1192_s18 = sphi %s1224_s18, %s15_s18  }
   0x2   : > { %p187_p1 = scmp.lt.s32.totalorder %s1192_s18, 3 }
   0x4   : > { %p188_p2 = pnand %p884_p0, %p187_p1 }
   0x5   : > { %p214_p3 = scmp.lt.s32.totalorder (!%p188_p2), %s880_s19, 1 }
   0x6   : > { %191 = sbr.rel (%p188_p2) target bundleno = 351 (0x15f), region = 40 }
   0xb   : > { %v1125_v0 = vld [vmem:[%s1433_s1 + $0x38] sm:$0xff]  ;;  %v1124_v3 = vld [vmem:[%s1433_s1 + $0x30] sm:$0xff]  ;;  %v1123_v8 = vld [vmem:[%s1433_s1 + $0x28] sm:$0xff]  ;;  %s1439_s19 = smov (!%p214_p3, %s880_s19), 1  ;;  %vm648_vm0 = vcmask 130048  }
   0xc   : > { %v1133_v1 = vld [vmem:[%s1433_s1 + $0x78] sm:$0xff]  ;;  %652 = vmatpush.bf16.msra.mxu0 %v1125_v0  ;;  %v1132_v4 = vld [vmem:[%s1433_s1 + $0x70] sm:$0xff]  ;;  %v1131_v9 = vld [vmem:[%s1433_s1 + $0x68] sm:$0xff]  ;;  %s1175_s12 = smul.u32 28, %s1439_s19  ;;  %s886_s27 = sshll.u32 %s1439_s19, 3 }
   0xd   : > { %v1141_v2 = vld [vmem:[%s1433_s1 + $0xb8] sm:$0xff]  ;;  %665 = vmatpush.bf16.msra.mxu1 %v1133_v1  ;;  %v1140_v5 = vld [vmem:[%s1433_s1 + $0xb0] sm:$0xff]  ;;  %v1139_v10 = vld [vmem:[%s1433_s1 + $0xa8] sm:$0xff] }
   0xe   : > { %678 = vmatpush.bf16.msra.mxu2 %v1141_v2  ;;  %v1149_v6 = vld [vmem:[%s1433_s1 + $0xf8] sm:$0xff]  ;;  %v1148_v7 = vld [vmem:[%s1433_s1 + $0xf0] sm:$0xff]  ;;  %v1147_v11 = vld [vmem:[%s1433_s1 + $0xe8] sm:$0xff]  ;;  %s1314_s25 = scalar_lea.vmem %s1432_s0, %s1175_s12 }
   0xf   : > { %691 = vmatpush.bf16.msra.mxu3 %v1149_v6  ;;  %v1122_v12 = vld [vmem:[%s1433_s1 + $0x20] sm:$0xff]  ;;  %v1121_v16 = vld [vmem:[%s1433_s1 + $0x18] sm:$0xff]  ;;  %v1120_v20 = vld [vmem:[%s1433_s1 + $0x10] sm:$0xff] }
  0x10   : > { %653 = vmatpush.bf16.msra.mxu0 %v1124_v3  ;;  %v1130_v13 = vld [vmem:[%s1433_s1 + $0x60] sm:$0xff]  ;;  %v1129_v17 = vld [vmem:[%s1433_s1 + $0x58] sm:$0xff]  ;;  %v1128_v21 = vld [vmem:[%s1433_s1 + $0x50] sm:$0xff] }
  0x11   : > { %666 = vmatpush.bf16.msra.mxu1 %v1132_v4  ;;  %v1138_v14 = vld [vmem:[%s1433_s1 + $0xa0] sm:$0xff]  ;;  %v1137_v18 = vld [vmem:[%s1433_s1 + $0x98] sm:$0xff]  ;;  %v1136_v22 = vld [vmem:[%s1433_s1 + $0x90] sm:$0xff] }
  0x12   : > { %679 = vmatpush.bf16.msra.mxu2 %v1140_v5  ;;  %v1146_v15 = vld [vmem:[%s1433_s1 + $0xe0] sm:$0xff]  ;;  %v1145_v19 = vld [vmem:[%s1433_s1 + $0xd8] sm:$0xff]  ;;  %v1144_v23 = vld [vmem:[%s1433_s1 + $0xd0] sm:$0xff] }
  0x13   : > { %692 = vmatpush.bf16.msra.mxu3 %v1148_v7  ;;  %v1119_v24 = vld [vmem:[%s1433_s1 + $0x8] sm:$0xff]  ;;  %v224_v26 = vld [vmem:[%s1314_s25] sm:$0xff]  ;;  %v1157_v34 = vld [vmem:[%s1433_s1 + $0x138] sm:$0xff] }
  0x14   : > { %654 = vmatpush.bf16.msra.mxu0 %v1123_v8  ;;  %v1127_v25 = vld [vmem:[%s1433_s1 + $0x48] sm:$0xff]  ;;  %v334_v29 = vunpack.c.l.b16 %v224_v26  ;;  %v335_v31 = vunpack.c.h.b16 %v224_v26  ;;  %v1118_v32 = vld [vmem:[%s1433_s1] sm:$0xff]  ;;  %v1165_v35 = vld [vmem:[%s1433_s1 + $0x178] sm:$0xff] }
  0x15   : > { %667 = vmatpush.bf16.msra.mxu1 %v1131_v9  ;;  %v1135_v27 = vld [vmem:[%s1433_s1 + $0x88] sm:$0xff]  ;;  %v1126_v33 = vld [vmem:[%s1433_s1 + $0x40] sm:$0xff]  ;;  %v1156_v43 = vld [vmem:[%s1433_s1 + $0x130] sm:$0xff] }
  0x16   : > { %680 = vmatpush.bf16.msra.mxu2 %v1139_v10  ;;  %v225_v28 = vld [vmem:[%s1314_s25 + $0x8] sm:$0xff]  ;;  %v1134_v36 = vld [vmem:[%s1433_s1 + $0x80] sm:$0xff]  ;;  %v341_v38 = vpack.c.b16 %v334_v29, %v334_v29  ;;  %v342_v39 = vpack.c.b16 %v335_v31, %v335_v31  ;;  %v1164_v44 = vld [vmem:[%s1433_s1 + $0x170] sm:$0xff] }
  0x17   : > { %693 = vmatpush.bf16.msra.mxu3 %v1147_v11  ;;  %v1143_v30 = vld [vmem:[%s1433_s1 + $0xc8] sm:$0xff]  ;;  %v336_v37 = vunpack.c.l.b16 %v225_v28  ;;  %v337_v40 = vunpack.c.h.b16 %v225_v28  ;;  %v1142_v41 = vld [vmem:[%s1433_s1 + $0xc0] sm:$0xff]  ;;  %v227_v51 = vld [vmem:[%s1314_s25 + $0x18] sm:$0xf] }
  0x18   : > { %655 = vmatpush.bf16.msra.mxu0 %v1122_v12  ;;  %v1166_v42 = vld [vmem:[%s1433_s1 + $0x180] sm:$0xff]  ;;  %v1155_v47 = vld [vmem:[%s1433_s1 + $0x128] sm:$0xff]  ;;  %v1153_v52 = vld [vmem:[%s1433_s1 + $0x118] sm:$0xff]  ;;  %v340_v54 = vunpack.c.l.b16 %v227_v51 }
  0x19   : > { %668 = vmatpush.bf16.msra.mxu1 %v1130_v13  ;;  %v343_v45 = vpack.c.b16 %v336_v37, %v336_v37  ;;  %v344_v46 = vpack.c.b16 %v337_v40, %v337_v40  ;;  %v1163_v48 = vld [vmem:[%s1433_s1 + $0x168] sm:$0xff]  ;;  %v1154_v49 = vld [vmem:[%s1433_s1 + $0x120] sm:$0xff]  ;;  %v1161_v53 = vld [vmem:[%s1433_s1 + $0x158] sm:$0xff] }
  0x1a   : > { %681 = vmatpush.bf16.msra.mxu2 %v1138_v14  ;;  %v1162_v50 = vld [vmem:[%s1433_s1 + $0x160] sm:$0xff]  ;;  %v1152_v55 = vld [vmem:[%s1433_s1 + $0x110] sm:$0xff]  ;;  %v347_v57 = vpack.c.b16 %v340_v54, %v340_v54  ;;  %v1151_v58 = vld [vmem:[%s1433_s1 + $0x108] sm:$0xff] }
  0x1b   : > { %694 = vmatpush.bf16.msra.mxu3 %v1146_v15  ;;  %v1160_v56 = vld [vmem:[%s1433_s1 + $0x150] sm:$0xff]  ;;  %v1159_v59 = vld [vmem:[%s1433_s1 + $0x148] sm:$0xff]  ;;  %v1150_v63 = vld [vmem:[%s1433_s1 + $0x100] sm:$0xff] }
  0x1c   : > { %656 = vmatpush.bf16.msra.mxu0 %v1121_v16  ;;  %v226_v60 = vld [vmem:[%s1314_s25 + $0x10] sm:$0xff]  ;;  %v1158_v0 = vld [vmem:[%s1433_s1 + $0x140] sm:$0xff]  ;;  %v1174_v3 = vld [vmem:[%s1435_s3 + $0x38] sm:$0xff]  ;;  %s222_s25 = scalar_lea.vmem %s1437_s5, %s886_s27 }
  0x1d   : > { %669 = vmatpush.bf16.msra.mxu1 %v1129_v17  ;;  %v338_v61 = vunpack.c.l.b16 %v226_v60  ;;  %v339_v62 = vunpack.c.h.b16 %v226_v60  ;;  %v1173_v4 = vld [vmem:[%s1435_s3 + $0x30] sm:$0xff]  ;;  %v1172_v5 = vld [vmem:[%s1435_s3 + $0x28] sm:$0xff]  ;;  %v1171_v6 = vld [vmem:[%s1435_s3 + $0x20] sm:$0xff] }
  0x1e   : > { %682 = vmatpush.bf16.msra.mxu2 %v1137_v18  ;;  %v1170_v7 = vld [vmem:[%s1435_s3 + $0x18] sm:$0xff]  ;;  %v1169_v8 = vld [vmem:[%s1435_s3 + $0x10] sm:$0xff]  ;;  %v1168_v9 = vld [vmem:[%s1435_s3 + $0x8] sm:$0xff] }
  0x1f   : > { %695 = vmatpush.bf16.msra.mxu3 %v1145_v19  ;;  %v345_v1 = vpack.c.b16 %v338_v61, %v338_v61  ;;  %v346_v2 = vpack.c.b16 %v339_v62, %v339_v62  ;;  %v1167_v12 = vld [vmem:[%s1435_s3] sm:$0xff] }
  0x20   : > { %657 = vmatpush.bf16.msra.mxu0 %v1120_v20  ;;  %v1184_v17 = vld [vmem:[%s1434_s2] ss:$0 sm:$0xff] }
  0x21   : > { %670 = vmatpush.bf16.msra.mxu1 %v1128_v21 }
  0x22   : > { %683 = vmatpush.bf16.msra.mxu2 %v1136_v22 }
  0x23   : > { %696 = vmatpush.bf16.msra.mxu3 %v1144_v23 }
  0x24   : > { %658 = vmatpush.bf16.msra.mxu0 %v1119_v24 }
  0x25   : > { %671 = vmatpush.bf16.msra.mxu1 %v1127_v25 }
  0x26   : > { %684 = vmatpush.bf16.msra.mxu2 %v1135_v27 }
  0x27   : > { %697 = vmatpush.bf16.msra.mxu3 %v1143_v30 }
  0x28   : > { %659 = vmatpush.bf16.msra.mxu0 %v1118_v32 }
  0x29   : > { %672 = vmatpush.bf16.msra.mxu1 %v1126_v33 }
  0x2a   : > { %685 = vmatpush.bf16.msra.mxu2 %v1134_v36 }
  0x2b   : > { %660 = vmatmul.bf16.vlgmr.msra.gmra.mxu0 %v341_v38  ;;  %698 = vmatpush.bf16.msra.mxu3 %v1142_v41 }
  0x2c   : > { %704 = vmatpush.bf16.msrb.mxu0 %v1157_v34  ;;  %673 = vmatmul.bf16.vlgmr.msra.gmra.mxu1 %v342_v39 }
  0x2d   : > { %717 = vmatpush.bf16.msrb.mxu1 %v1165_v35  ;;  %686 = vmatmul.bf16.vlgmr.msra.gmra.mxu2 %v343_v45  ;;  %v1185_v35 = vld [vmem:[%s1436_s4] ss:$0 sm:$0xff] }
  0x2e   : > { %737 = vmatpush.bf16.msrb.mxu2 %v1166_v42  ;;  %699 = vmatmul.bf16.vlgmr.msra.gmra.mxu3 %v344_v46 }
  0x2f   : > { %813 = vmatpush.bf16.msrb.mxu3 %v1174_v3 }
  0x30   : > { %705 = vmatpush.bf16.msrb.mxu0 %v1156_v43 }
  0x31   : > { %718 = vmatpush.bf16.msrb.mxu1 %v1164_v44 }
  0x33   : > { %814 = vmatpush.bf16.msrb.mxu3 %v1173_v4 }
  0x34   : > { %706 = vmatpush.bf16.msrb.mxu0 %v1155_v47 }
  0x35   : > { %719 = vmatpush.bf16.msrb.mxu1 %v1163_v48 }
  0x37   : > { %815 = vmatpush.bf16.msrb.mxu3 %v1172_v5 }
  0x38   : > { %707 = vmatpush.bf16.msrb.mxu0 %v1154_v49 }
  0x39   : > { %720 = vmatpush.bf16.msrb.mxu1 %v1162_v50 }
  0x3b   : > { %816 = vmatpush.bf16.msrb.mxu3 %v1171_v6 }
  0x3c   : > { %708 = vmatpush.bf16.msrb.mxu0 %v1153_v52 }
  0x3d   : > { %721 = vmatpush.bf16.msrb.mxu1 %v1161_v53  ;;  %1083 = vmatmul.msk.bf16.vlgmr.msrb.gmra.mxu2 %vm648_vm0, %v347_v57 }
  0x3f   : > { %817 = vmatpush.bf16.msrb.mxu3 %v1170_v7 }
  0x40   : > { %709 = vmatpush.bf16.msrb.mxu0 %v1152_v55 }
  0x41   : > { %722 = vmatpush.bf16.msrb.mxu1 %v1160_v56 }
  0x43   : > { %818 = vmatpush.bf16.msrb.mxu3 %v1169_v8 }
  0x44   : > { %710 = vmatpush.bf16.msrb.mxu0 %v1151_v58 }
  0x45   : > { %723 = vmatpush.bf16.msrb.mxu1 %v1159_v59 }
  0x47   : > { %819 = vmatpush.bf16.msrb.mxu3 %v1168_v9 }
  0x48   : > { %711 = vmatpush.bf16.msrb.mxu0 %v1150_v63 }
  0x49   : > { %724 = vmatpush.bf16.msrb.mxu1 %v1158_v0 }
  0x4b   : > { %712 = vmatmul.bf16.vlgmr.msrb.gmra.mxu0 %v345_v1  ;;  %820 = vmatpush.bf16.msrb.mxu3 %v1167_v12 }
  0x4c   : > { %725 = vmatmul.bf16.vlgmr.msrb.gmra.mxu1 %v346_v2 }
  0xa8   : > { %v661_v10 = vpop.f32.mrf.mxu0 }
  0xa9   : > { %v674_v11 = vpop.f32.mrf.mxu1  ;;  %v662_v18 = vadd.f32 %v1184_v17, %v661_v10 }
  0xab   : > { %v675_v21 = vadd.f32 %v674_v11, %v662_v18 }
  0xb0   : > { %v663_v13 = vpop.f32.mrf.mxu0  ;;  %v687_v15 = vpop.f32.mrf.mxu2 }
  0xb1   : > { %v676_v14 = vpop.f32.mrf.mxu1  ;;  %v700_v16 = vpop.f32.mrf.mxu3  ;;  %v688_v22 = vadd.f32 %v687_v15, %v675_v21 }
  0xb3   : > { %v701_v24 = vadd.f32 %v700_v16, %v688_v22 }
  0xb8   : > { %v689_v19 = vpop.f32.mrf.mxu2 }
  0xb9   : > { %v702_v20 = vpop.f32.mrf.mxu3 }
  0xc0   : > { %v739_v23 = vpop.f32.mrf.mxu2 }
  0xc8   : > { %v713_v25 = vpop.f32.mrf.mxu0  ;;  %v741_v29 = vpop.f32.mrf.mxu2 }
  0xc9   : > { %v726_v26 = vpop.f32.mrf.mxu1  ;;  %v714_v27 = vadd.f32 %v713_v25, %v701_v24 }
  0xcb   : > { %v727_v28 = vadd.f32 %v726_v26, %v714_v27 }
  0xcd   : > { %v740_v30 = vadd.f32 %v739_v23, %v727_v28 }
  0xcf   : > { %v743_v31 = vmax.f32 %v740_v30, 0.0 }
  0xd0   : > { %v715_v32 = vpop.f32.mrf.mxu0 }
  0xd1   : > { %v728_v33 = vpop.f32.mrf.mxu1  ;;  %v744_v34 = vpack.c.bf16 %v743_v31, %v743_v31 }
  0xd3   : > { %821 = vmatmul.bf16.vlgmr.msrb.gmra.mxu3 %v744_v34 }
 0x156   : > { %v822_v36 = vpop.f32.mrf.mxu3 }
 0x157   : > { %v823_v37 = vadd.f32 %v1185_v35, %v822_v36 }
 0x159   : > { %826 = vst [vmem:[%s222_s25] sm:$0xff] %v823_v37 }
 0x15e   : > { %v824_v38 = vpop.f32.mrf.mxu3 }
 0x15f PF: > { %s15_s18 = sadd.s32 1, %s1192_s18  }
 0x160   : > { %p12_p4 = scmp.ge.s32.totalorder %s15_s18, 4  }
 0x162   :  { %14 = sbr.rel (!%p12_p4) target bundleno = 1 (0x1), region = 70 }

</bundles_post_ra>
